<compile_context>
chip_gen: v7x
topology: tpu7x:2x2x1
jax: 0.10.0
libtpu: 0.0.40
codegen_flags: <defaults>
</compile_context>

<pallas_src>
import functools

import jax
import jax.numpy as jnp
from jax import lax
from jax.experimental import pallas as pl
from jax.experimental.pallas import tpu as pltpu

_NTAP = 27       # 3*3*3 stencil taps
_NTAP_PAD = 32   # pad the contraction dim to a multiple of 8 sublanes


@functools.lru_cache(maxsize=None)
def _roll_sign():
    """+1 if pltpu.roll follows jnp.roll's sign convention, -1 otherwise.

    Tiny one-off probe so the stencil shifts stay correct across jax versions.
    """
    def probe(x_ref, o_ref):
        o_ref[...] = pltpu.roll(x_ref[...], shift=1, axis=1)

    x = jnp.arange(256, dtype=jnp.float32).reshape(1, 256)
    y = pl.pallas_call(probe, out_shape=jax.ShapeDtypeStruct((1, 256), jnp.float32))(x)
    return 1 if bool(jnp.allclose(y, jnp.roll(x, 1, axis=1))) else -1


def _make_lot_kernel(H, W, D, roll_sign):
    flat = H * W * D
    npad = _NTAP_PAD - _NTAP
    # flat lane offsets of the 27 taps, same ordering as weight.reshape(Cout, 27)
    offsets = [a * W * D + b * D + c
               for a in (-1, 0, 1) for b in (-1, 0, 1) for c in (-1, 0, 1)]
    shifts = [(-roll_sign * t) % flat for t in offsets]

    def kernel(w_ref, phi_ref, mask_ref, out_ref, pr_ref, pi_ref):
        # w_ref    : VMEM (Cout, 32)   scale-folded taps (cols 27..31 are zero)
        # phi_ref  : VMEM (1, flat)    phase volume, voxels flattened onto lanes
        # mask_ref : VMEM (1, flat)    data mask * interior (boundary-zero) mask
        # out_ref  : VMEM (Cout, flat)
        # pr/pi    : VMEM (32, flat)   im2col patch matrices for cos / sin
        phi = phi_ref[...]
        cosv = jnp.cos(phi)   # expPhi_r -- computed ONCE per batch element
        sinv = jnp.sin(phi)   # expPhi_i

        # zero the pad tap rows so zero weights never meet uninitialised VMEM
        zpad = jnp.zeros((npad, flat), jnp.float32)
        pr_ref[pl.ds(_NTAP, npad), :] = zpad
        pi_ref[pl.ds(_NTAP, npad), :] = zpad

        # im2col: each 3x3x3 tap is a pure lane shift of the flattened volume
        # (interior voxels never wrap; wrapped boundary voxels are masked later)
        for tap, sh in enumerate(shifts):
            if sh == 0:
                cs, sn = cosv, sinv
            else:
                cs = pltpu.roll(cosv, shift=sh, axis=1)
                sn = pltpu.roll(sinv, shift=sh, axis=1)
            pr_ref[pl.ds(tap, 1), :] = cs
            pi_ref[pl.ds(tap, 1), :] = sn

        # all 16 output channels of both branches in one MXU matmul per part
        w = w_ref[...]
        a_r = jnp.dot(w, pr_ref[...], preferred_element_type=jnp.float32)
        a_i = jnp.dot(w, pi_ref[...], preferred_element_type=jnp.float32)

        # (a_i*cos - a_r*sin) * mask ; scale folded into w, boundary zeroing
        # folded into mask -> single full-width lane-dense store.
        out_ref[...] = ((a_i * cosv - a_r * sinv) * mask_ref[...]).astype(out_ref.dtype)

    return kernel


def lot_layer_forward(phi, mask, TE, B0, conv_x, conv_y):
    """Pallas equivalent of LoTLayer.forward(phi, mask, TE, B0) -> (b_i, d_i)."""
    N, Cin, H, W, D = phi.shape
    assert Cin == 1 and conv_x.shape[1:] == (1, 3, 3, 3) and conv_y.shape[1:] == (1, 3, 3, 3), (
        "kernel assumes Cin == 1 and 3x3x3 taps (stride 1, padding 1)")
    flat = H * W * D
    assert flat % 128 == 0, "flattened volume must fill whole lanes"
    cx, cy = conv_x.shape[0], conv_y.shape[0]
    Cout = cx + cy

    # fold the (3 * 0.02) / (B0 * TE) scale into the (linear) conv weights and
    # stack both branches into one weight matrix; pad taps 27 -> 32.
    scale = (3.0 * 0.02) / (B0 * TE)
    w = jnp.concatenate(
        [conv_x.reshape(cx, _NTAP), conv_y.reshape(cy, _NTAP)], axis=0)
    w = jnp.pad(w.astype(jnp.float32) * scale, ((0, 0), (0, _NTAP_PAD - _NTAP)))

    # fold the LG() boundary zeroing into the mask (exact: boundary voxels are
    # zero either way), flatten voxels onto the lane axis.
    def ax(n):
        idx = jnp.arange(n)
        return (idx > 0) & (idx < n - 1)

    interior = ax(H)[:, None, None] & ax(W)[None, :, None] & ax(D)[None, None, :]
    mask_eff = mask.reshape(N, H, W, D) * interior[None].astype(mask.dtype)
    phi_flat = phi.astype(jnp.float32).reshape(N, 1, flat)
    mask_flat = mask_eff.astype(jnp.float32).reshape(N, 1, flat)

    kernel = _make_lot_kernel(H, W, D, _roll_sign())

    out = pl.pallas_call(
        kernel,
        out_shape=jax.ShapeDtypeStruct((N, Cout, flat), jnp.float32),
        grid=(N,),
        in_specs=[
            pl.BlockSpec((Cout, _NTAP_PAD), lambda n: (0, 0)),    # weights (resident)
            pl.BlockSpec((None, 1, flat), lambda n: (n, 0, 0)),   # phi, one batch row
            pl.BlockSpec((None, 1, flat), lambda n: (n, 0, 0)),   # mask, one batch row
        ],
        out_specs=pl.BlockSpec((None, Cout, flat), lambda n: (n, 0, 0)),
        scratch_shapes=[
            pltpu.VMEM((_NTAP_PAD, flat), jnp.float32),           # cos patch matrix
            pltpu.VMEM((_NTAP_PAD, flat), jnp.float32),           # sin patch matrix
        ],
        compiler_params=pltpu.CompilerParams(
            dimension_semantics=("parallel",),        # shard batch across cores
            vmem_limit_bytes=64 * 1024 * 1024,        # raise default scoped limit
        ),
    )(w, phi_flat, mask_flat)

    out = out.reshape(N, Cout, H, W, D)
    return out[:, :cx], out[:, cx:]


# ---- pure-JAX reference (correctness check only) ---------------------------
def _ref_forward(phi, mask, TE, B0, conv_x, conv_y):
    def lg(x, w):
        out = lax.conv_general_dilated(
            x, w, window_strides=(1, 1, 1), padding=((1, 1),) * 3,
            dimension_numbers=("NCDHW", "OIDHW", "NCDHW"),
            precision=lax.Precision.HIGHEST)
        out = out.at[:, :, 0, :, :].set(0.0).at[:, :, -1, :, :].set(0.0)
        out = out.at[:, :, :, 0, :].set(0.0).at[:, :, :, -1, :].set(0.0)
        out = out.at[:, :, :, :, 0].set(0.0).at[:, :, :, :, -1].set(0.0)
        return out

    er, ei = jnp.cos(phi), jnp.sin(phi)

    def branch(w):
        a_r, a_i = lg(er, w), lg(ei, w)
        b = (a_i * er - a_r * ei) * mask
        return b / (B0 * TE) * (3 * 0.02)

    return branch(conv_x), branch(conv_y)


if __name__ == "__main__":
    key = jax.random.PRNGKey(0)
    k1, k2, k3 = jax.random.split(key, 3)

    N, C, H, W, D = 2, 1, 16, 16, 16
    phi = jax.random.uniform(k1, (N, C, H, W, D), jnp.float32, -3.14, 3.14)
    mask = (jax.random.uniform(k2, (N, C, H, W, D)) > 0.3).astype(jnp.float32)

    # conv_x is (1, 1, 3, 3, 3); conv_y mirrors LoTLayer.__init__ (repeat x15),
    # but the kernel treats them as independent trainable parameters.
    conv_x = jax.random.normal(k3, (1, 1, 3, 3, 3), jnp.float32) * 0.1
    conv_y = jnp.tile(conv_x, (15, 1, 1, 1, 1))

    TE, B0 = 0.004, 3.0

    b_i, d_i = lot_layer_forward(phi, mask, TE, B0, conv_x, conv_y)
    jax.block_until_ready((b_i, d_i))

    rb, rd = _ref_forward(phi, mask, TE, B0, conv_x, conv_y)
    assert b_i.shape == (N, 1, H, W, D) and d_i.shape == (N, 15, H, W, D)

    # boundary slabs must be exactly zero (LG() zeroing)
    for arr in (b_i, d_i):
        edge = (jnp.abs(arr[:, :, 0]).max() + jnp.abs(arr[:, :, -1]).max()
                + jnp.abs(arr[:, :, :, 0]).max() + jnp.abs(arr[:, :, :, -1]).max()
                + jnp.abs(arr[..., 0]).max() + jnp.abs(arr[..., -1]).max())
        assert float(edge) == 0.0

    # scale-aware tolerance: the in-kernel MXU f32 matmul may use bf16-pass
    # decomposition depending on chip/compiler defaults.
    def rel_to_max(a, b):
        return float(jnp.max(jnp.abs(a - b)) / jnp.maximum(jnp.max(jnp.abs(b)), 1e-6))

    assert rel_to_max(b_i, rb) < 2e-2, rel_to_max(b_i, rb)
    assert rel_to_max(d_i, rd) < 2e-2, rel_to_max(d_i, rd)

    print("KERNEL_OK")
</pallas_src>

<mosaic_0001>
module attributes {stable_mosaic.version = 11 : i64} {
  func.func @probe(%arg0: memref<1x256xf32, #tpu.memory_space<vmem>>, %arg1: memref<1x256xf32, #tpu.memory_space<vmem>>) attributes {dimension_semantics = [], scalar_prefetch = 0 : i64, scratch_operands = 0 : i64, tpu.core_type = #tpu.core_type<tc>} {
    %c0 = arith.constant 0 : index
    %c0_0 = arith.constant 0 : index
    %0 = vector.load %arg0[%c0, %c0_0] : memref<1x256xf32, #tpu.memory_space<vmem>>, vector<1x256xf32>
    %c1_i32 = arith.constant 1 : i32
    %1 = tpu.dynamic_rotate %0 by %c1_i32 dim 1 : vector<1x256xf32>, i32 -> vector<1x256xf32>
    %c0_1 = arith.constant 0 : index
    %c0_2 = arith.constant 0 : index
    %2 = vector.load %arg1[%c0_1, %c0_2] : memref<1x256xf32, #tpu.memory_space<vmem>>, vector<1x256xf32>
    tpu.vector_store %arg1[%c0_1, %c0_2], %1 {strides = array<i32>} : memref<1x256xf32, #tpu.memory_space<vmem>>, vector<1x256xf32>,
    return
  }
}

</mosaic_0001>

<bundles_post_ra>
// kernel: tpu_custom_call.1
= control target key start
LH: loop header
LB: loop body
LE: loop exit
PB: predicated region body
PF: predicated region fallthrough
CT: control target
= control target key end

     0   :  { %6 = vsyncpa [#allocation3], 0  ;;  %s170_s0 = inlined_call_operand.hbm [shape: f32[1,256], index: 0, kind: input, shape index: {}]   ;;  %s171_s1 = inlined_call_operand.hbm [shape: f32[1,256], index: 1, kind: output, shape index: {}]  }
   0x1   :  { %7 = vsyncpa [#allocation4], 0  ;;  %s132_s6 = smov [#allocation2]   ;;  %s84_s10 = scalar_lea.hbm %s170_s0, 32 }
   0x2   :  { %s14_s7 = sshll.u32 %s132_s6, 4  ;;  %p85_p0 = scmp.ne.s32.totalorder %s170_s0, %s84_s10  ;;  %s15_s7 = int_to_ptr.vmem [resolvable:$true] %s14_s7 }
   0x3   :  { %p88_p1 = scmp.lt.u32.totalorder %s84_s10, %s170_s0 }
   0x5   :  { %p90_p2 = pnand %p88_p1, %p85_p0 }
   0x7   :  { %93 = shalt.err (!%p90_p2)
}
   0x8   :  { %s94_s15 = scalar_lea.vmem %s15_s7, 32  ;;  %p99_p4 = scmp.lt.s32.totalorder %s15_s7, %s15_s7 }
   0x9   :  { %p95_p3 = scmp.ne.s32.totalorder %s15_s7, %s94_s15  ;;  %p100_p5 = scmp.lt.s32.totalorder %s94_s15, %s94_s15 }
   0xb   :  { %p101_p6 = por %p100_p5, %p99_p4 }
   0xd   :  { %p102_p7 = pnand %p101_p6, %p95_p3 }
   0xf   :  { %105 = shalt.err (!%p102_p7)
}
  0x10   :  { %17 = dma.hbm_to_vmem [thread:$0]  %s170_s0, 32, %s15_s7, [#allocation3]  }
  0x11   :  { %128 = dma.done.wait [#allocation3], 32  }
  0x12   :  { %129 = vsyncadd [#allocation3], 4294967264  ;;  %v23_v0 = vlaneseq  ;;  %v21_v4 = vld [vmem:[#allocation2] sm:$0x3]  ;;  %s133_s18 = smov 1   ;;  %s135_s0 = smov [#allocation5]  }
  0x13   :  { %v134_v7 = vmov 1966171168   ;;  %s71_s19 = sshll.u32 %s135_s0, 4  ;;  %s72_s19 = int_to_ptr.vmem [resolvable:$true] %s71_s19 }
  0x14   :  { %v24_v1 = vshrl.u32 %v23_v0, 7  ;;  %v46_v8 = vunpack.c.l.s4 %v134_v7  ;;  %v38_v9 = vand.u32 127, %v23_v0  ;;  %vm62_vm1 = vcmp.lt.s32.totalorder %v23_v0, 256  ;;  %s106_s20 = scalar_lea.vmem %s72_s19, 32  ;;  %p111_p9 = scmp.lt.s32.totalorder %s72_s19, %s72_s19 }
  0x15   :  { %p107_p8 = scmp.ne.s32.totalorder %s72_s19, %s106_s20  ;;  %p112_p10 = scmp.lt.s32.totalorder %s106_s20, %s106_s20 }
  0x16   :  { %v25_v2 = vsub.s32 0, %v24_v1  ;;  %v29_v3 = vsub.s32 1, %v24_v1  ;;  %v47_v11 = vunpack.c.0.s8 %v46_v8  ;;  %vm39_vm0 = vcmp.lt.s32.totalorder %v38_v9, 1 }
  0x17   :  { %p113_p11 = por %p112_p10, %p111_p9 }
  0x18   :  { %v26_v5 = vrot.slane %v21_v4, %v25_v2  ;;  %v30_v6 = vrot.slane %v21_v4, %v29_v3  ;;  %v50_v12 = vsub.s32 %v47_v11, %v24_v1 }
  0x19   :  { %p114_p12 = pnand %p113_p11, %p107_p8 }
  0x1a   :  { %33 = vrot.lane.b32.xlu0 %v26_v5, %s133_s18 }
  0x1e   :  { %35 = vrot.lane.b32.xlu0 %v30_v6, %s133_s18 }
  0x8c   :  { %v34_v10 = vpop.permute.xlu0 %33 }
  0x90   :  { %v36_v13 = vpop.permute.xlu0 %35 }
  0x91   :  { %v40_v14 = vsel %vm39_vm0, %v34_v10, %v36_v13  ;;  %v41_v15 = vsel %vm39_vm0, %v36_v13, %v34_v10 }
  0x92   :  { %v44_v16 = vcombine.low %v41_v15, %v40_v14 }
  0x94   :  { %v51_v17 = vrot.slane %v44_v16, %v50_v12 }
  0x96   :  { %v58_v18 = vrot.slane %v51_v17, %v50_v12 }
  0x98   :  { %64 = vst.msk [vmem:[#allocation5] sm:$0x3] %vm62_vm1, %v58_v18 }
  0x99   :  { %117 = shalt.err (!%p114_p12)
}
  0x9a   :  { %s118_s23 = scalar_lea.hbm %s171_s1, 32 }
  0x9b   :  { %p119_p13 = scmp.ne.s32.totalorder %s171_s1, %s118_s23  ;;  %p122_p0 = scmp.lt.u32.totalorder %s118_s23, %s171_s1 }
  0x9d   :  { %p124_p1 = pnand %p122_p0, %p119_p13 }
  0x9f   :  { %127 = shalt.err (!%p124_p1)
}
  0xa0   :  { %74 = dma.vmem_to_hbm [thread:$0]  %s72_s19, 32, %s171_s1, [#allocation4]  }
  0xa1   :  { %130 = dma.done.wait [#allocation4], 32  }
  0xa2   :  { %131 = vsyncadd [#allocation4], 4294967264 }
  0xa3   :  { %78 = vsyncpa [#allocation3], 1 }
  0xa4   :  { %79 = vsyncpa [#allocation4], 1 }

</bundles_post_ra>
